<compile_context>
chip_gen: v7x
topology: tpu7x:2x2x1
jax: 0.10.0
libtpu: 0.0.40
codegen_flags: <defaults>
</compile_context>

<pallas_src>
import functools

import jax
import jax.numpy as jnp
from jax.experimental import pallas as pl
from jax.experimental.pallas import tpu as pltpu


def _total_loss_eval_kernel(labels_ref, scores_ref, out_ref, acc_ref, *, n_total):
    """One grid step processes a lane tile of TN samples for all 3 heads.

    labels_ref: (1, TN)   int32  VMEM   lane-dense labels
    scores_ref: (3*C, TN) any    VMEM   heads stacked on sublanes: [pos | neg | seg]
    out_ref:    (4,)      f32    SMEM   [total, loss_pos, loss_neg, loss_seg]
    acc_ref:    (3, TN)   f32    VMEM   per-lane partial sums, one row per head
    """
    i = pl.program_id(0)
    three_c, tn = scores_ref.shape
    c = three_c // 3

    @pl.when(i == 0)
    def _init():
        acc_ref[...] = jnp.zeros_like(acc_ref)

    labels = labels_ref[...]                                        # (1, TN) int32
    class_ids = jax.lax.broadcasted_iota(jnp.int32, (c, tn), 0)     # (C, TN)
    onehot = (class_ids == labels).astype(jnp.float32)              # (C, TN)

    # Lane-validity mask: batch may be padded / last block may be ragged.
    col = jax.lax.broadcasted_iota(jnp.int32, (1, tn), 1) + i * tn  # (1, TN)
    valid = col < n_total                                           # (1, TN) bool

    # One load of the whole (3C, TN) block; static per-head sublane slices.
    s_all = scores_ref[...].astype(jnp.float32)                     # (3C, TN)
    s_pos = s_all[0:c, :]
    s_neg = s_all[c:2 * c, :]
    s_seg = s_all[2 * c:3 * c, :]

    def _lse(s):                          # numerically stable logsumexp over C
        m = jnp.max(s, axis=0, keepdims=True)                       # (1, TN)
        return m + jnp.log(jnp.sum(jnp.exp(s - m), axis=0, keepdims=True))

    # Per-sample losses (all (1, TN)):
    #   CE         = lse - s[label]
    #   -mean(LSM) = lse - mean_c(s)
    per_pos = _lse(s_pos) - jnp.sum(s_pos * onehot, axis=0, keepdims=True)
    per_neg = _lse(s_neg) - jnp.mean(s_neg, axis=0, keepdims=True)
    per_seg = _lse(s_seg) - jnp.sum(s_seg * onehot, axis=0, keepdims=True)

    per = jnp.concatenate([per_pos, per_neg, per_seg], axis=0)      # (3, TN)
    # Boolean select (not multiply): robust to Inf/NaN garbage in invalid lanes.
    acc_ref[...] += jnp.where(valid, per, jnp.float32(0.0))

    @pl.when(i == pl.num_programs(0) - 1)
    def _finalize():
        inv_n = jnp.float32(1.0 / n_total)
        acc = acc_ref[...]
        loss_pos = jnp.sum(acc[0:1, :]) * inv_n
        loss_neg = jnp.sum(acc[1:2, :]) * inv_n
        loss_seg = jnp.sum(acc[2:3, :]) * inv_n
        out_ref[0] = loss_seg + loss_pos + loss_neg
        out_ref[1] = loss_pos
        out_ref[2] = loss_neg
        out_ref[3] = loss_seg


def total_loss_eval(netoutput, labels, masks_t=None, *, lane_tile=32768,
                    vmem_limit_bytes=None):
    """JAX/Pallas equivalent of TotalLossEval.forward.

    netoutput = ((scores_pos, maps_pos), (scores_neg, maps_neg),
                 masks, scores_seg, extra)
    labels: (N,) int class indices.
    masks_t: unused by forward (kept for signature parity).
    lane_tile: lane-axis tile (multiple of 128). 32768 keeps the working set
      ~7 MiB f32 (inside all default scoped-VMEM limits); pass 65536 together
      with an explicit vmem_limit_bytes on v5e.
    """
    (scores_pos, _mp), (scores_neg, _mn), _masks, scores_seg, _ = netoutput
    n, c = scores_pos.shape

    # Lane tile: multiple of 128, capped at lane_tile, no bigger than needed.
    n128 = ((n + 127) // 128) * 128
    tn = max(128, (min(lane_tile, n128) // 128) * 128)
    grid = (pl.cdiv(n128, tn),)

    # Heads folded onto the sublane axis: one fused transpose+concat copy to a
    # lane-dense (3*C, N) slab (batch on the 128-lane axis, classes on sublanes).
    stacked = jnp.concatenate(
        [scores_pos.T, scores_neg.T, scores_seg.T], axis=0)          # (3C, N)
    labels_ld = labels.astype(jnp.int32).reshape(1, n)                # (1, N)
    if n128 != n:
        # Tiny (<128 lane) alignment pad; fuses into the concat copy. Padded
        # lanes are excluded in-kernel via the `col < n_total` select.
        stacked = jnp.pad(stacked, ((0, 0), (0, n128 - n)))
        labels_ld = jnp.pad(labels_ld, ((0, 0), (0, n128 - n)))

    itemsize = jnp.dtype(scores_pos.dtype).itemsize
    cost = pl.CostEstimate(
        flops=int(30 * n * c),                       # ~10 flops/elem, 3 heads
        transcendentals=int(3 * n * (c + 1)),        # exp per elem + log per row
        bytes_accessed=int(3 * n * c * itemsize + n * 4 + 4 * 4),
    )

    kernel = functools.partial(_total_loss_eval_kernel, n_total=n)

    out = pl.pallas_call(
        kernel,
        out_shape=jax.ShapeDtypeStruct((4,), jnp.float32),
        grid_spec=pltpu.PrefetchScalarGridSpec(
            num_scalar_prefetch=0,
            grid=grid,
            in_specs=[
                pl.BlockSpec((1, tn), lambda i: (0, i)),        # labels, lane-dense
                pl.BlockSpec((3 * c, tn), lambda i: (0, i)),    # folded-head scores
            ],
            out_specs=pl.BlockSpec(memory_space=pltpu.SMEM),
            scratch_shapes=[
                pltpu.VMEM((3, tn), jnp.float32),   # per-head per-lane accumulators
            ],
        ),
        compiler_params=pltpu.CompilerParams(
            dimension_semantics=("arbitrary",),     # accumulator lives across the grid
            vmem_limit_bytes=vmem_limit_bytes,
        ),
        cost_estimate=cost,
    )(labels_ld, stacked)

    total_loss, loss_pos, loss_neg, loss_class_seg = out[0], out[1], out[2], out[3]
    return total_loss, loss_pos, loss_neg, loss_class_seg


def _reference(netoutput, labels):
    """Pure-JAX reference of the same math (for verification)."""
    (scores_pos, _), (scores_neg, _), _m, scores_seg, _ = netoutput

    def ce_mean(s, y):
        ls = jax.nn.log_softmax(s.astype(jnp.float32), axis=1)
        return -jnp.mean(jnp.take_along_axis(ls, y[:, None], axis=1))

    loss_pos = ce_mean(scores_pos, labels)
    loss_seg = ce_mean(scores_seg, labels)
    loss_neg = -jnp.mean(jnp.mean(
        jax.nn.log_softmax(scores_neg.astype(jnp.float32), axis=1), axis=1))
    return loss_seg + loss_pos + loss_neg, loss_pos, loss_neg, loss_seg


if __name__ == "__main__":
    key = jax.random.PRNGKey(0)
    N, C, H, W = 2, 4, 16, 16   # small shapes: batch=2, classes=4, spatial=16

    k1, k2, k3, k4, k5, k6 = jax.random.split(key, 6)
    scores_pos = jax.random.normal(k1, (N, C), dtype=jnp.float32)
    scores_neg = jax.random.normal(k2, (N, C), dtype=jnp.float32)
    scores_seg = jax.random.normal(k3, (N, C), dtype=jnp.float32)
    maps_pos = jax.random.normal(k4, (N, C, H, W), dtype=jnp.float32)   # unused by forward
    maps_neg = jax.random.normal(k5, (N, C, H, W), dtype=jnp.float32)   # unused by forward
    masks = jax.random.uniform(k6, (N, 1, H, W), dtype=jnp.float32)     # unused by forward
    labels = jax.random.randint(jax.random.PRNGKey(1), (N,), 0, C, dtype=jnp.int32)

    netoutput = ((scores_pos, maps_pos), (scores_neg, maps_neg), masks, scores_seg, None)
    masks_t = [jax.random.uniform(jax.random.PRNGKey(2), (1, H, W), dtype=jnp.float32)]

    # TODO(synk): `dice()` is not part of forward(); not implemented as a kernel.

    result = total_loss_eval(netoutput, labels, masks_t)
    result = jax.block_until_ready(result)
    ref = _reference(netoutput, labels)
    for got, want in zip(result, ref):
        assert jnp.allclose(got, want, atol=1e-5, rtol=1e-5), (got, want)

    # Second check: larger batch exercising multiple grid steps + lane padding
    # (N=300 with lane_tile=128 -> grid of 3 steps, ragged/masked last tile).
    N2 = 300
    ka, kb, kc = jax.random.split(jax.random.PRNGKey(3), 3)
    sp2 = jax.random.normal(ka, (N2, C), dtype=jnp.float32)
    sn2 = jax.random.normal(kb, (N2, C), dtype=jnp.float32)
    ss2 = jax.random.normal(kc, (N2, C), dtype=jnp.float32)
    lab2 = jax.random.randint(jax.random.PRNGKey(4), (N2,), 0, C, dtype=jnp.int32)
    netoutput2 = ((sp2, None), (sn2, None), None, ss2, None)

    result2 = total_loss_eval(netoutput2, lab2, None, lane_tile=128)
    result2 = jax.block_until_ready(result2)
    ref2 = _reference(netoutput2, lab2)
    for got, want in zip(result2, ref2):
        assert jnp.allclose(got, want, atol=1e-5, rtol=1e-5), (got, want)

    print("KERNEL_OK")
</pallas_src>

<mosaic_0001>
module attributes {stable_mosaic.version = 11 : i64} {
  func.func @_total_loss_eval_kernel(%arg0: i32, %arg1: memref<1x128xi32, #tpu.memory_space<vmem>>, %arg2: memref<12x128xf32, #tpu.memory_space<vmem>>, %arg3: memref<4xf32, #tpu.memory_space<smem>>, %arg4: memref<3x128xf32, #tpu.memory_space<vmem>>) attributes {dimension_semantics = [#tpu.dimension_semantics<arbitrary>], iteration_bounds = array<i64: 1>, scalar_prefetch = 0 : i64, scratch_operands = 1 : i64, tpu.core_type = #tpu.core_type<tc>, window_params = [{transform_indices = @transform_0, window_bounds = array<i64: 1, 128>}, {transform_indices = @transform_1, window_bounds = array<i64: 12, 128>}, {transform_indices = @transform_2, window_bounds = array<i64: 4>}]} {
    %c0_i32 = arith.constant 0 : i32
    %0 = arith.cmpi eq, %arg0, %c0_i32 : i32
    %1 = arith.extui %0 : i1 to i32
    %c0_i32_0 = arith.constant 0 : i32
    %2 = arith.cmpi ne, %1, %c0_i32_0 : i32
    scf.if %2 {
      %cst_20 = arith.constant 0.000000e+00 : f32
      %70 = vector.broadcast %cst_20 : f32 to vector<3x128xf32>
      %c0_21 = arith.constant 0 : index
      %c0_22 = arith.constant 0 : index
      %71 = vector.load %arg4[%c0_21, %c0_22] : memref<3x128xf32, #tpu.memory_space<vmem>>, vector<3x128xf32>
      tpu.vector_store %arg4[%c0_21, %c0_22], %70 {strides = array<i32>} : memref<3x128xf32, #tpu.memory_space<vmem>>, vector<3x128xf32>,
    } else {
    }
    %c0 = arith.constant 0 : index
    %c0_1 = arith.constant 0 : index
    %3 = vector.load %arg1[%c0, %c0_1] : memref<1x128xi32, #tpu.memory_space<vmem>>, vector<1x128xi32>
    %4 = tpu.iota {dimensions = array<i32: 0>} : vector<4x128xi32>
    %5 = vector.broadcast %3 : vector<1x128xi32> to vector<4x128xi32>
    %6 = arith.cmpi eq, %4, %5 : vector<4x128xi32>
    %7 = arith.extui %6 : vector<4x128xi1> to vector<4x128xi32>
    %8 = arith.sitofp %7 : vector<4x128xi32> to vector<4x128xf32>
    %9 = tpu.iota {dimensions = array<i32: 1>} : vector<1x128xi32>
    %c128_i32 = arith.constant 128 : i32
    %10 = arith.muli %arg0, %c128_i32 : i32
    %11 = vector.broadcast %10 : i32 to vector<1x128xi32>
    %12 = arith.addi %9, %11 : vector<1x128xi32>
    %c2_i32 = arith.constant 2 : i32
    %13 = vector.broadcast %c2_i32 : i32 to vector<1x128xi32>
    %14 = arith.cmpi slt, %12, %13 : vector<1x128xi32>
    %c0_2 = arith.constant 0 : index
    %c0_3 = arith.constant 0 : index
    %15 = vector.load %arg2[%c0_2, %c0_3] : memref<12x128xf32, #tpu.memory_space<vmem>>, vector<12x128xf32>
    %16 = vector.extract_strided_slice %15 {offsets = [0, 0], sizes = [4, 128], strides = [1, 1]} : vector<12x128xf32> to vector<4x128xf32>
    %17 = vector.extract_strided_slice %15 {offsets = [4, 0], sizes = [4, 128], strides = [1, 1]} : vector<12x128xf32> to vector<4x128xf32>
    %18 = vector.extract_strided_slice %15 {offsets = [8, 0], sizes = [4, 128], strides = [1, 1]} : vector<12x128xf32> to vector<4x128xf32>
    %cst = arith.constant dense<0xFF800000> : vector<128xf32>
    %19 = vector.multi_reduction <maximumf>, %16, %cst [0] : vector<4x128xf32> to vector<128xf32>
    %20 = vector.shape_cast %19 : vector<128xf32> to vector<1x128xf32>
    %21 = vector.broadcast %20 : vector<1x128xf32> to vector<4x128xf32>
    %22 = arith.subf %16, %21 : vector<4x128xf32>
    %23 = math.exp %22 : vector<4x128xf32>
    %cst_4 = arith.constant dense<0.000000e+00> : vector<128xf32>
    %24 = vector.multi_reduction <add>, %23, %cst_4 [0] : vector<4x128xf32> to vector<128xf32>
    %25 = vector.shape_cast %24 : vector<128xf32> to vector<1x128xf32>
    %26 = math.log %25 : vector<1x128xf32>
    %27 = arith.addf %20, %26 : vector<1x128xf32>
    %28 = arith.mulf %16, %8 : vector<4x128xf32>
    %cst_5 = arith.constant dense<0.000000e+00> : vector<128xf32>
    %29 = vector.multi_reduction <add>, %28, %cst_5 [0] : vector<4x128xf32> to vector<128xf32>
    %30 = vector.shape_cast %29 : vector<128xf32> to vector<1x128xf32>
    %31 = arith.subf %27, %30 : vector<1x128xf32>
    %cst_6 = arith.constant dense<0xFF800000> : vector<128xf32>
    %32 = vector.multi_reduction <maximumf>, %17, %cst_6 [0] : vector<4x128xf32> to vector<128xf32>
    %33 = vector.shape_cast %32 : vector<128xf32> to vector<1x128xf32>
    %34 = vector.broadcast %33 : vector<1x128xf32> to vector<4x128xf32>
    %35 = arith.subf %17, %34 : vector<4x128xf32>
    %36 = math.exp %35 : vector<4x128xf32>
    %cst_7 = arith.constant dense<0.000000e+00> : vector<128xf32>
    %37 = vector.multi_reduction <add>, %36, %cst_7 [0] : vector<4x128xf32> to vector<128xf32>
    %38 = vector.shape_cast %37 : vector<128xf32> to vector<1x128xf32>
    %39 = math.log %38 : vector<1x128xf32>
    %40 = arith.addf %33, %39 : vector<1x128xf32>
    %cst_8 = arith.constant dense<0.000000e+00> : vector<128xf32>
    %41 = vector.multi_reduction <add>, %17, %cst_8 [0] : vector<4x128xf32> to vector<128xf32>
    %42 = vector.shape_cast %41 : vector<128xf32> to vector<1x128xf32>
    %cst_9 = arith.constant 4.000000e+00 : f32
    %43 = vector.broadcast %cst_9 : f32 to vector<1x128xf32>
    %44 = arith.divf %42, %43 : vector<1x128xf32>
    %45 = arith.subf %40, %44 : vector<1x128xf32>
    %cst_10 = arith.constant dense<0xFF800000> : vector<128xf32>
    %46 = vector.multi_reduction <maximumf>, %18, %cst_10 [0] : vector<4x128xf32> to vector<128xf32>
    %47 = vector.shape_cast %46 : vector<128xf32> to vector<1x128xf32>
    %48 = vector.broadcast %47 : vector<1x128xf32> to vector<4x128xf32>
    %49 = arith.subf %18, %48 : vector<4x128xf32>
    %50 = math.exp %49 : vector<4x128xf32>
    %cst_11 = arith.constant dense<0.000000e+00> : vector<128xf32>
    %51 = vector.multi_reduction <add>, %50, %cst_11 [0] : vector<4x128xf32> to vector<128xf32>
    %52 = vector.shape_cast %51 : vector<128xf32> to vector<1x128xf32>
    %53 = math.log %52 : vector<1x128xf32>
    %54 = arith.addf %47, %53 : vector<1x128xf32>
    %55 = arith.mulf %18, %8 : vector<4x128xf32>
    %cst_12 = arith.constant dense<0.000000e+00> : vector<128xf32>
    %56 = vector.multi_reduction <add>, %55, %cst_12 [0] : vector<4x128xf32> to vector<128xf32>
    %57 = vector.shape_cast %56 : vector<128xf32> to vector<1x128xf32>
    %58 = arith.subf %54, %57 : vector<1x128xf32>
    %59 = tpu.concatenate %31, %45, %58 in 0 : vector<1x128xf32>, vector<1x128xf32>, vector<1x128xf32> -> vector<3x128xf32>
    %c0_13 = arith.constant 0 : index
    %c0_14 = arith.constant 0 : index
    %60 = vector.load %arg4[%c0_13, %c0_14] : memref<3x128xf32, #tpu.memory_space<vmem>>, vector<3x128xf32>
    %cst_15 = arith.constant 0.000000e+00 : f32
    %61 = vector.shape_cast %14 : vector<1x128xi1> to vector<1x128xi1>
    %62 = vector.broadcast %61 : vector<1x128xi1> to vector<3x128xi1>
    %63 = vector.broadcast %cst_15 : f32 to vector<3x128xf32>
    %64 = arith.select %62, %59, %63 : vector<3x128xi1>, vector<3x128xf32>
    %65 = arith.addf %60, %64 : vector<3x128xf32>
    %c0_16 = arith.constant 0 : index
    %c0_17 = arith.constant 0 : index
    %66 = vector.load %arg4[%c0_16, %c0_17] : memref<3x128xf32, #tpu.memory_space<vmem>>, vector<3x128xf32>
    tpu.vector_store %arg4[%c0_16, %c0_17], %65 {strides = array<i32>} : memref<3x128xf32, #tpu.memory_space<vmem>>, vector<3x128xf32>,
    %c0_i32_18 = arith.constant 0 : i32
    %67 = arith.cmpi eq, %arg0, %c0_i32_18 : i32
    %68 = arith.extui %67 : i1 to i32
    %c0_i32_19 = arith.constant 0 : i32
    %69 = arith.cmpi ne, %68, %c0_i32_19 : i32
    scf.if %69 {
      %c0_20 = arith.constant 0 : index
      %c0_21 = arith.constant 0 : index
      %70 = vector.load %arg4[%c0_20, %c0_21] : memref<3x128xf32, #tpu.memory_space<vmem>>, vector<3x128xf32>
      %71 = vector.extract_strided_slice %70 {offsets = [0, 0], sizes = [1, 128], strides = [1, 1]} : vector<3x128xf32> to vector<1x128xf32>
      %72 = vector.shape_cast %71 : vector<1x128xf32> to vector<1x1x128xf32>
      %cst_22 = arith.constant dense<0.000000e+00> : vector<1xf32>
      %73 = vector.multi_reduction <add>, %72, %cst_22 [1, 2] : vector<1x1x128xf32> to vector<1xf32>
      %74 = vector.shape_cast %73 : vector<1xf32> to vector<1x1x1xf32>
      %75 = vector.extract %74[0, 0, 0] : f32 from vector<1x1x1xf32>
      %cst_23 = arith.constant 5.000000e-01 : f32
      %76 = arith.mulf %75, %cst_23 : f32
      %77 = vector.extract_strided_slice %70 {offsets = [1, 0], sizes = [1, 128], strides = [1, 1]} : vector<3x128xf32> to vector<1x128xf32>
      %78 = vector.shape_cast %77 : vector<1x128xf32> to vector<1x1x128xf32>
      %cst_24 = arith.constant dense<0.000000e+00> : vector<1xf32>
      %79 = vector.multi_reduction <add>, %78, %cst_24 [1, 2] : vector<1x1x128xf32> to vector<1xf32>
      %80 = vector.shape_cast %79 : vector<1xf32> to vector<1x1x1xf32>
      %81 = vector.extract %80[0, 0, 0] : f32 from vector<1x1x1xf32>
      %cst_25 = arith.constant 5.000000e-01 : f32
      %82 = arith.mulf %81, %cst_25 : f32
      %83 = vector.extract_strided_slice %70 {offsets = [2, 0], sizes = [1, 128], strides = [1, 1]} : vector<3x128xf32> to vector<1x128xf32>
      %84 = vector.shape_cast %83 : vector<1x128xf32> to vector<1x1x128xf32>
      %cst_26 = arith.constant dense<0.000000e+00> : vector<1xf32>
      %85 = vector.multi_reduction <add>, %84, %cst_26 [1, 2] : vector<1x1x128xf32> to vector<1xf32>
      %86 = vector.shape_cast %85 : vector<1xf32> to vector<1x1x1xf32>
      %87 = vector.extract %86[0, 0, 0] : f32 from vector<1x1x1xf32>
      %cst_27 = arith.constant 5.000000e-01 : f32
      %88 = arith.mulf %87, %cst_27 : f32
      %89 = arith.addf %88, %76 : f32
      %90 = arith.addf %89, %82 : f32
      %c0_28 = arith.constant 0 : index
      %91 = memref.load %arg3[%c0_28] : memref<4xf32, #tpu.memory_space<smem>>
      memref.store %90, %arg3[%c0_28] : memref<4xf32, #tpu.memory_space<smem>>
      %c1 = arith.constant 1 : index
      %92 = memref.load %arg3[%c1] : memref<4xf32, #tpu.memory_space<smem>>
      memref.store %76, %arg3[%c1] : memref<4xf32, #tpu.memory_space<smem>>
      %c2 = arith.constant 2 : index
      %93 = memref.load %arg3[%c2] : memref<4xf32, #tpu.memory_space<smem>>
      memref.store %82, %arg3[%c2] : memref<4xf32, #tpu.memory_space<smem>>
      %c3 = arith.constant 3 : index
      %94 = memref.load %arg3[%c3] : memref<4xf32, #tpu.memory_space<smem>>
      memref.store %88, %arg3[%c3] : memref<4xf32, #tpu.memory_space<smem>>
    } else {
    }
    return
  }
  func.func @transform_0(%arg0: i32) -> (i32, i32) {
    %c0_i32 = arith.constant 0 : i32
    %c0_i32_0 = arith.constant 0 : i32
    return %c0_i32, %arg0 : i32, i32
  }
  func.func @transform_1(%arg0: i32) -> (i32, i32) {
    %c0_i32 = arith.constant 0 : i32
    %c0_i32_0 = arith.constant 0 : i32
    return %c0_i32, %arg0 : i32, i32
  }
  func.func @transform_2(%arg0: i32) -> i32 {
    %c0_i32 = arith.constant 0 : i32
    %c0_i32_0 = arith.constant 0 : i32
    return %c0_i32 : i32
  }
}

</mosaic_0001>

<bundles_post_ra>
// kernel: tpu_custom_call.1
= control target key start
LH: loop header
LB: loop body
LE: loop exit
PB: predicated region body
PF: predicated region fallthrough
CT: control target
= control target key end

     0   :  { %7 = vsyncpa [#allocation4], 0  ;;  %s410_s0 = inlined_call_operand.hbm [shape: s32[1,128], index: 0, kind: input, shape index: {}]   ;;  %s411_s1 = inlined_call_operand.hbm [shape: f32[12,128], index: 1, kind: input, shape index: {}]   ;;  %s412_s2 = inlined_call_operand.hbm [shape: f32[4], index: 2, kind: output, shape index: {}]  }
   0x1   :  { %8 = vsyncpa [#allocation7], 0 }
   0x2   :  { %9 = vsyncpa [#allocation5], 0  ;;  %s320_s9 = smov [#allocation3]   ;;  %s321_s11 = smov [#allocation6]  }
   0x3   :  { %s16_s10 = sshll.u32 %s320_s9, 4  ;;  %s25_s12 = sshll.u32 %s321_s11, 4  ;;  %s17_s10 = int_to_ptr.vmem [resolvable:$true] %s16_s10  ;;  %s341_s12 = int_to_ptr.vmem [resolvable:$true] %s25_s12 }
   0x4   :  { %s260_s15 = scalar_lea.hbm %s410_s0, 16 }
   0x5   :  { %p261_p0 = scmp.ne.s32.totalorder %s410_s0, %s260_s15  ;;  %p264_p1 = scmp.lt.u32.totalorder %s260_s15, %s410_s0 }
   0x7   :  { %p266_p2 = pnand %p264_p1, %p261_p0 }
   0x9   :  { %269 = shalt.err (!%p266_p2)
}
   0xa   :  { %s270_s20 = scalar_lea.vmem %s17_s10, 16  ;;  %s274_s21 = scalar_lea.vmem %s17_s10, 32 }
   0xb   :  { %p271_p3 = scmp.ne.s32.totalorder %s17_s10, %s270_s20  ;;  %p275_p4 = scmp.lt.s32.totalorder %s17_s10, %s17_s10 }
   0xc   :  { %p276_p5 = scmp.lt.s32.totalorder %s274_s21, %s270_s20 }
   0xe   :  { %p277_p6 = por %p276_p5, %p275_p4 }
  0x10   :  { %p278_p7 = pnand %p277_p6, %p271_p3 }
  0x12   :  { %281 = shalt.err (!%p278_p7)
}
  0x13   :  { %19 = dma.hbm_to_vmem [thread:$0]  %s410_s0, 16, %s17_s10, [#allocation4]  }
  0x14   :  { %s282_s26 = scalar_lea.hbm %s411_s1, 256 }
  0x15   :  { %p283_p8 = scmp.ne.s32.totalorder %s411_s1, %s282_s26  ;;  %p286_p9 = scmp.lt.u32.totalorder %s282_s26, %s411_s1 }
  0x17   :  { %p288_p10 = pnand %p286_p9, %p283_p8 }
  0x19   :  { %291 = shalt.err (!%p288_p10)
}
  0x1a   :  { %s292_s3 = scalar_lea.vmem %s341_s12, 256  ;;  %p297_p12 = scmp.lt.s32.totalorder %s341_s12, %s341_s12 }
  0x1b   :  { %p293_p11 = scmp.ne.s32.totalorder %s341_s12, %s292_s3  ;;  %p298_p13 = scmp.lt.s32.totalorder %s292_s3, %s292_s3 }
  0x1d   :  { %p299_p0 = por %p298_p13, %p297_p12 }
  0x1f   :  { %p300_p1 = pnand %p299_p0, %p293_p11 }
  0x21   :  { %303 = shalt.err (!%p300_p1)
}
  0x22   :  { %s322_s0 = smov 128   ;;  %s323_s4 = smov 8  }
  0x23   :  { %31 = dma.hbm_to_vmem [thread:$0]  %s411_s1, 256, %s341_s12, [#allocation7], %s322_s0, %s322_s0, %s323_s4  }
  0x24   :  { %314 = dma.done.wait [#allocation4], 16  }
  0x25   :  { %315 = vsyncadd [#allocation4], 4294967280 }
  0x26   :  { %316 = dma.done.wait [#allocation7], 256  }
  0x27   :  { %317 = vsyncadd [#allocation7], 4294967040  ;;  %v324_v0 = vmov 0.0   ;;  %vm61_vm0 = vcmask 1043456   ;;  %vm91_vm1 = vcmask 1047556   ;;  %v59_v1 = vld [vmem:[#allocation6] sm:$0xff]  ;;  %v44_v23 = vlaneseq }
  0x28   :  { %42 = vst [vmem:[#allocation2] sm:$0x7] %v324_v0  ;;  %v60_v2 = vld [vmem:[#allocation6 + $0x8] sm:$0xf]  ;;  %v62_v3 = vsel %vm61_vm0, %v59_v1, -inf  ;;  %v92_v4 = vsel %vm91_vm1, %v59_v1, -inf }
  0x29   :  { %v63_v5 = vrot.slane %v62_v3, 4  ;;  %v93_v6 = vrot.slane %v92_v4, 4  ;;  %v128_v7 = vsel %vm61_vm0, %v60_v2, -inf  ;;  %v45_v30 = vshrl.u32 %v44_v23, 7  ;;  %v234_v32 = vld [vmem:[#allocation3] ss:$0 sm:$0xff] }
  0x2a   :  { %v129_v8 = vrot.slane %v128_v7, 4  ;;  %v116_v34 = vrot.slane %v59_v1, 4  ;;  %vm157_vm3 = vcmask 1040384   ;;  %vm159_vm4 = vcmask 1041408   ;;  %s304_s16 = scalar_lea.hbm %s412_s2, 16 }
  0x2b   :  { %v64_v9 = vmax.f32 %v62_v3, %v63_v5  ;;  %v94_v10 = vmax.f32 %v92_v4, %v93_v6  ;;  %vm50_vm2 = vcmp.eq.s32.totalorder %v45_v30, %v234_v32  ;;  %p305_p2 = scmp.ne.s32.totalorder %s412_s2, %s304_s16  ;;  %p308_p3 = scmp.lt.u32.totalorder %s304_s16, %s412_s2 }
  0x2c   :  { %v130_v11 = vmax.f32 %v128_v7, %v129_v8  ;;  %v235_v33 = vsel %vm50_vm2, 1.0, %v324_v0  ;;  %v118_v37 = vsel %vm61_vm0, %v116_v34, 0.0 }
  0x2d   :  { %v65_v12 = vrot.slane %v64_v9, 2  ;;  %v95_v13 = vrot.slane %v94_v10, 2  ;;  %v82_v35 = vmul.f32 %v235_v33, %v59_v1  ;;  %v148_v38 = vmul.f32 %v235_v33, %v60_v2  ;;  %p310_p4 = pnand %p308_p3, %p305_p2 }
  0x2e   :  { %v131_v14 = vrot.slane %v130_v11, 2  ;;  %v119_v45 = vrot.slane %v118_v37, 4 }
  0x2f   :  { %v66_v15 = vmax.f32 %v64_v9, %v65_v12  ;;  %v96_v16 = vmax.f32 %v94_v10, %v95_v13  ;;  %v83_v44 = vsel %vm61_vm0, %v82_v35, 0.0  ;;  %v149_v50 = vsel %vm61_vm0, %v148_v38, 0.0  ;;  %v161_v38 = vld [vmem:[#allocation2] sm:$0x7] }
  0x30   :  { %v132_v17 = vmax.f32 %v130_v11, %v131_v14  ;;  %v84_v53 = vrot.slane %v83_v44, 4  ;;  %v150_v56 = vrot.slane %v149_v50, 4  ;;  %v120_v58 = vadd.f32 %v119_v45, %v118_v37 }
  0x31   :  { %v67_v18 = vrot.slane %v66_v15, 1  ;;  %v97_v19 = vrot.slane %v96_v16, 1 }
  0x32   :  { %v133_v20 = vrot.slane %v132_v17, 1  ;;  %v85_v62 = vadd.f32 %v84_v53, %v83_v44  ;;  %v121_v3 = vrot.slane %v120_v58, 2 }
  0x33   :  { %v374_v21 = vmax.f32 %v66_v15, %v67_v18  ;;  %v376_v22 = vmax.f32 %v96_v16, %v97_v19 }
  0x34   :  { %v378_v24 = vmax.f32 %v132_v17, %v133_v20  ;;  %v86_v6 = vrot.slane %v85_v62, 2  ;;  %v122_v10 = vadd.f32 %v121_v3, %v120_v58 }
  0x35   :  { %v69_v25 = vsub.f32 %v59_v1, %v374_v21  ;;  %v99_v26 = vsub.f32 %v59_v1, %v376_v22  ;;  %v151_v1 = vadd.f32 %v150_v56, %v149_v50 }
  0x36   :  { %v135_v27 = vsub.f32 %v60_v2, %v378_v24  ;;  %v87_v11 = vadd.f32 %v86_v6, %v85_v62  ;;  %v123_v13 = vrot.slane %v122_v10, 1 }
  0x37   :  { %v70_v28 = vmul.f32 1.442695, %v69_v25  ;;  %v100_v29 = vmul.f32 1.442695, %v99_v26  ;;  %v152_v9 = vrot.slane %v151_v1, 2 }
  0x38   :  { %v136_v31 = vmul.f32 1.442695, %v135_v27  ;;  %v88_v14 = vrot.slane %v87_v11, 1  ;;  %v124_v17 = vadd.f32 %v123_v13, %v122_v10 }
  0x39   :  { %248 = vpow2.f32 %v70_v28  ;;  %v153_v12 = vadd.f32 %v152_v9, %v151_v1 }
  0x3a   :  { %250 = vpow2.f32 %v100_v29  ;;  %v89_v20 = vadd.f32 %v88_v14, %v87_v11  ;;  %v126_v30 = vmul.f32 0.25, %v124_v17 }
  0x3b   :  { %252 = vpow2.f32 %v136_v31  ;;  %v154_v15 = vrot.slane %v153_v12, 1  ;;  %v54_v31 = vand.u32 127, %v44_v23 }
  0x3d   :  { %v155_v28 = vadd.f32 %v154_v15, %v153_v12  ;;  %vm58_vm5 = vcmp.lt.s32.totalorder %v54_v31, 2 }
  0x43   :  { %v249_v36 = vpop.eup %248 }
  0x44   :  { %v251_v39 = vpop.eup %250  ;;  %v72_v40 = vsel %vm61_vm0, %v249_v36, 0.0 }
  0x45   :  { %v253_v41 = vpop.eup %252  ;;  %v73_v42 = vrot.slane %v72_v40, 4  ;;  %v103_v43 = vrot.slane %v251_v39, 4 }
  0x46   :  { %v138_v46 = vsel %vm61_vm0, %v253_v41, 0.0 }
  0x47   :  { %v74_v47 = vadd.f32 %v73_v42, %v72_v40  ;;  %v105_v48 = vsel %vm61_vm0, %v103_v43, 0.0  ;;  %v139_v49 = vrot.slane %v138_v46, 4 }
  0x48   :  { %v106_v51 = vrot.slane %v105_v48, 4 }
  0x49   :  { %v75_v52 = vrot.slane %v74_v47, 2  ;;  %v140_v54 = vadd.f32 %v139_v49, %v138_v46 }
  0x4a   :  { %v107_v55 = vadd.f32 %v106_v51, %v105_v48 }
  0x4b   :  { %v76_v57 = vadd.f32 %v75_v52, %v74_v47  ;;  %v141_v59 = vrot.slane %v140_v54, 2 }
  0x4c   :  { %v108_v60 = vrot.slane %v107_v55, 2 }
  0x4d   :  { %v77_v61 = vrot.slane %v76_v57, 1  ;;  %v142_v63 = vadd.f32 %v141_v59, %v140_v54 }
  0x4e   :  { %v109_v0 = vadd.f32 %v108_v60, %v107_v55 }
  0x4f   :  { %v78_v2 = vadd.f32 %v77_v61, %v76_v57  ;;  %v143_v4 = vrot.slane %v142_v63, 1 }
  0x50   :  { %v110_v5 = vrot.slane %v109_v0, 1 }
  0x51   :  { %254 = vlog2.f32 %v78_v2  ;;  %v144_v7 = vadd.f32 %v143_v4, %v142_v63 }
  0x52   :  { %v111_v8 = vadd.f32 %v110_v5, %v109_v0 }
  0x53   :  { %256 = vlog2.f32 %v144_v7 }
  0x54   :  { %258 = vlog2.f32 %v111_v8 }
  0x5b   :  { %v255_v16 = vpop.eup %254 }
  0x5c   :  { %v80_v18 = vmul.f32 0.6931472, %v255_v16 }
  0x5d   :  { %v257_v19 = vpop.eup %256 }
  0x5e   :  { %v259_v25 = vpop.eup %258  ;;  %v81_v26 = vadd.f32 %v80_v18, %v374_v21  ;;  %v146_v27 = vmul.f32 0.6931472, %v257_v19 }
  0x5f   :  { %v113_v29 = vmul.f32 0.6931472, %v259_v25 }
  0x60   :  { %v147_v32 = vadd.f32 %v146_v27, %v378_v24  ;;  %v90_v33 = vsub.f32 %v81_v26, %v89_v20 }
  0x61   :  { %v114_v34 = vadd.f32 %v113_v29, %v376_v22 }
  0x62   :  { %v156_v35 = vsub.f32 %v147_v32, %v155_v28 }
  0x63   :  { %v127_v36 = vsub.f32 %v114_v34, %v126_v30 }
  0x65   :  { %v158_v37 = vsel %vm157_vm3, %v90_v33, %v127_v36 }
  0x66   :  { %v160_v21 = vsel %vm159_vm4, %v158_v37, %v156_v35 }
  0x67   :  { %v164_v39 = vsel %vm58_vm5, %v160_v21, 0.0 }
  0x68   :  { %v165_v40 = vadd.f32 %v164_v39, %v161_v38 }
  0x6a   :  { %166 = vst [vmem:[#allocation2] sm:$0x7] %v165_v40 }
  0x71   :  { %v170_v41 = vld [vmem:[#allocation2] sm:$0x7] }
  0x72   :  { %v171_v23 = vsel %vm157_vm3, %v170_v41, 0.0  ;;  %v196_v42 = vrot.slane %v170_v41, 2  ;;  %v183_v24 = vrot.slane %v170_v41, 1 }
  0x73   :  { %172 = vadd.xlane.f32.xlu0 %v171_v23 }
  0x74   :  { %v198_v22 = vsel %vm157_vm3, %v196_v42, 0.0  ;;  %v185_v43 = vsel %vm157_vm3, %v183_v24, 0.0 }
  0x75   :  { %199 = vadd.xlane.f32.xlu1 %v198_v22 }
  0x77   :  { %186 = vadd.xlane.f32.xlu0 %v185_v43 }
 0x100   :  { %v173_v44 = vpop.xlane.xlu0 %172 }
 0x101   :  { %v174_v45 = vrot.slane %v173_v44, 4 }
 0x102   :  { %v200_v46 = vpop.xlane.xlu1 %199 }
 0x103   :  { %v175_v47 = vadd.f32 %v174_v45, %v173_v44  ;;  %v201_v48 = vrot.slane %v200_v46, 4 }
 0x104   :  { %v187_v49 = vpop.xlane.xlu0 %186 }
 0x105   :  { %v176_v50 = vrot.slane %v175_v47, 2  ;;  %v202_v51 = vadd.f32 %v201_v48, %v200_v46  ;;  %v188_v52 = vrot.slane %v187_v49, 4 }
 0x107   :  { %v203_v53 = vrot.slane %v202_v51, 2  ;;  %v189_v54 = vadd.f32 %v188_v52, %v187_v49  ;;  %v177_v55 = vadd.f32 %v176_v50, %v175_v47 }
 0x109   :  { %v204_v56 = vadd.f32 %v203_v53, %v202_v51  ;;  %v190_v57 = vrot.slane %v189_v54, 2  ;;  %v178_v58 = vrot.slane %v177_v55, 1 }
 0x10b   :  { %v191_v59 = vadd.f32 %v190_v57, %v189_v54  ;;  %v179_v60 = vadd.f32 %v178_v58, %v177_v55  ;;  %v205_v61 = vrot.slane %v204_v56, 1 }
 0x10d   :  { %236 = vpush %v179_v60  ;;  %v192_v62 = vrot.slane %v191_v59, 1  ;;  %v206_v0 = vadd.f32 %v205_v61, %v204_v56 }
 0x10f   :  { %v193_v63 = vadd.f32 %v192_v62, %v191_v59 }
 0x111   :  { %238 = vpush %v193_v63 }
 0x112   :  { %240 = vpush %v206_v0 }
 0x13e   :  { %s237_s1 = spop %236 }
 0x13f   :  { %s181_s7 = smul.f32 0.5, %s237_s1 }
 0x141   :  { %214 = sst [smem:[#allocation8 + $0x1]] %s181_s7 }
 0x142   :  { %s239_s8 = spop %238 }
 0x143   :  { %s195_s9 = smul.f32 0.5, %s239_s8  ;;  %s241_s10 = spop %240 }
 0x144   :  { %s208_s11 = smul.f32 0.5, %s241_s10 }
 0x145   :  { %216 = sst [smem:[#allocation8 + $0x2]] %s195_s9 }
 0x146   :  { %s209_s12 = sadd.f32 %s208_s11, %s181_s7 }
 0x147   :  { %218 = sst [smem:[#allocation8 + $0x3]] %s208_s11 }
 0x148   :  { %s210_s13 = sadd.f32 %s209_s12, %s195_s9 }
 0x14a   :  { %212 = sst [smem:[#allocation8]] %s210_s13 }
 0x14b   :  { %313 = shalt.err (!%p310_p4)
}
 0x14c   :  { %s325_s21 = smov [#allocation8]  }
 0x14d   :  { %226 = dma.smem_to_hbm %s325_s21, 16, %s412_s2, [#allocation5]  }
 0x14e   :  { %318 = dma.done.wait [#allocation5], 16  }
 0x14f   :  { %319 = vsyncadd [#allocation5], 4294967280 }
 0x150   :  { %230 = sfence }
 0x151   :  { %231 = vsyncpa [#allocation4], 1 }
 0x152   :  { %232 = vsyncpa [#allocation7], 1 }
 0x153   :  { %233 = vsyncpa [#allocation5], 1 }

</bundles_post_ra>
